<compile_context>
chip_gen: v5e
topology: v5e:2x2
jax: 0.10.0
libtpu: 0.0.40
codegen_flags: <defaults>
</compile_context>

<pallas_src>
import jax
import jax.numpy as jnp
from jax.experimental import pallas as pl
from jax.experimental.pallas import tpu as pltpu

LANE = 128
SUBLANE = 8

H1_REAL, H2_REAL = 120, 84     # real hidden dims from the PyTorch module
H1, H2 = 128, 128              # lane-padded hidden dims used by the kernel


def _round_up(x, m):
    return (x + m - 1) // m * m


def qnetwork_kernel(x_ref, w1_ref, b1_ref, w2_ref, b2_ref, w3_ref, b3_ref, o_ref):
    # Layer 1: bf16 MXU matmul, f32 accumulate; bias + ReLU on the VPU in f32.
    h1 = jnp.dot(x_ref[...], w1_ref[...], preferred_element_type=jnp.float32)
    h1 = jnp.maximum(h1 + b1_ref[...], 0.0).astype(jnp.bfloat16)

    # Layer 2: same pattern.
    h2 = jnp.dot(h1, w2_ref[...], preferred_element_type=jnp.float32)
    h2 = jnp.maximum(h2 + b2_ref[...], 0.0).astype(jnp.bfloat16)

    # Layer 3: Q-values, lane-dense 128-wide padded output (no activation).
    out = jnp.dot(h2, w3_ref[...], preferred_element_type=jnp.float32)
    o_ref[...] = (out + b3_ref[...]).astype(o_ref.dtype)


def qnetwork_forward(x, params, n_actions, *, tb=256):
    """x: (B, in_dim) float. Returns (B, n_actions) float32."""
    w1, b1, w2, b2, w3, b3 = params
    B, in_dim = x.shape
    out_pad = w3.shape[1]

    # Batch tile: sublane-aligned, capped at `tb`; pad batch to a whole
    # number of tiles with zero rows (sliced off below).
    TB = min(tb, _round_up(B, SUBLANE))
    B_pad = _round_up(B, TB)
    if B_pad != B:
        x = jnp.pad(x, ((0, B_pad - B), (0, 0)))
    x = x.astype(jnp.bfloat16)

    grid = (B_pad // TB,)
    resident = lambda a: pl.BlockSpec(a.shape, lambda i: (0,) * a.ndim)

    flops = 2 * B_pad * (in_dim * H1 + H1 * H2 + H2 * out_pad)
    bytes_accessed = (
        x.size * x.dtype.itemsize
        + B_pad * out_pad * 4
        + sum(int(p.size) * p.dtype.itemsize for p in params)
    )

    out = pl.pallas_call(
        qnetwork_kernel,
        out_shape=jax.ShapeDtypeStruct((B_pad, out_pad), jnp.float32),
        grid=grid,
        in_specs=[
            pl.BlockSpec((TB, in_dim), lambda i: (i, 0)),  # x: batch-tiled
            resident(w1), resident(b1),                    # weights/biases stay
            resident(w2), resident(b2),                    # VMEM-resident
            resident(w3), resident(b3),
        ],
        out_specs=pl.BlockSpec((TB, out_pad), lambda i: (i, 0)),
        compiler_params=pltpu.CompilerParams(
            dimension_semantics=("parallel",)),
        cost_estimate=pl.CostEstimate(
            flops=flops, transcendentals=0, bytes_accessed=bytes_accessed),
    )(x, w1, b1, w2, b2, w3, b3)

    return out[:B, :n_actions]


def init_params(key, in_dim, n_actions):
    """PyTorch nn.Linear default init (uniform(-1/sqrt(fan_in), 1/sqrt(fan_in)))
    on the real dims, zero-padded to lane-aligned shapes. Weights stored as
    (in_features, out_features) bf16; biases as (1, out_features) f32."""
    out_pad = _round_up(n_actions, LANE)
    real_dims = [(in_dim, H1_REAL), (H1_REAL, H2_REAL), (H2_REAL, n_actions)]
    pad_dims = [(in_dim, H1), (H1, H2), (H2, out_pad)]
    params = []
    for i, ((fi, fo), (pi, po)) in enumerate(zip(real_dims, pad_dims)):
        kw, kb = jax.random.split(jax.random.fold_in(key, i))
        bound = 1.0 / jnp.sqrt(float(fi))
        w = jax.random.uniform(kw, (fi, fo), jnp.float32, -bound, bound)
        b = jax.random.uniform(kb, (1, fo), jnp.float32, -bound, bound)
        w_pad = jnp.zeros((pi, po), jnp.float32).at[:fi, :fo].set(w)
        b_pad = jnp.zeros((1, po), jnp.float32).at[:, :fo].set(b)
        params.extend([w_pad.astype(jnp.bfloat16), b_pad])
    return tuple(params)


def reference_forward(x, params, n_actions):
    """Pure-JAX reference mirroring the kernel's dtype choices
    (bf16 matmul inputs, f32 accumulation, f32 bias/ReLU)."""
    w1, b1, w2, b2, w3, b3 = params
    xb = x.astype(jnp.bfloat16)
    h1 = jnp.maximum(jnp.dot(xb, w1, preferred_element_type=jnp.float32) + b1, 0.0)
    h2 = jnp.maximum(
        jnp.dot(h1.astype(jnp.bfloat16), w2, preferred_element_type=jnp.float32) + b2, 0.0)
    out = jnp.dot(h2.astype(jnp.bfloat16), w3, preferred_element_type=jnp.float32) + b3
    return out[:, :n_actions]


if __name__ == "__main__":
    key = jax.random.PRNGKey(0)

    # Small, module-consistent shapes: obs_dim=28, nskills=4 -> in_dim=32; 6 actions.
    batch, obs_dim, nskills, n_actions = 8, 28, 4, 6
    in_dim = obs_dim + nskills

    kx, kp = jax.random.split(key)
    x = jax.random.normal(kx, (batch, in_dim), jnp.float32)
    params = init_params(kp, in_dim, n_actions)

    out = qnetwork_forward(x, params, n_actions)
    out = jax.block_until_ready(out)

    ref = reference_forward(x, params, n_actions)
    assert out.shape == (batch, n_actions)
    assert jnp.allclose(out, ref, atol=1e-3, rtol=1e-3), "mismatch vs reference"

    print("KERNEL_OK")
</pallas_src>

<mosaic_0001>
module attributes {stable_mosaic.version = 11 : i64} {
  func.func @qnetwork_kernel(%arg0: i32, %arg1: memref<8x32xbf16, #tpu.memory_space<vmem>>, %arg2: memref<32x128xbf16, #tpu.memory_space<vmem>>, %arg3: memref<1x128xf32, #tpu.memory_space<vmem>>, %arg4: memref<128x128xbf16, #tpu.memory_space<vmem>>, %arg5: memref<1x128xf32, #tpu.memory_space<vmem>>, %arg6: memref<128x128xbf16, #tpu.memory_space<vmem>>, %arg7: memref<1x128xf32, #tpu.memory_space<vmem>>, %arg8: memref<8x128xf32, #tpu.memory_space<vmem>>) attributes {dimension_semantics = [#tpu.dimension_semantics<parallel>], iteration_bounds = array<i64: 1>, scalar_prefetch = 0 : i64, scratch_operands = 0 : i64, tpu.core_type = #tpu.core_type<tc>, window_params = [{transform_indices = @transform_0, window_bounds = array<i64: 8, 32>}, {pipeline_mode = #tpu.pipeline_mode<synchronous>, transform_indices = @transform_1, window_bounds = array<i64: 32, 128>}, {pipeline_mode = #tpu.pipeline_mode<synchronous>, transform_indices = @transform_2, window_bounds = array<i64: 1, 128>}, {pipeline_mode = #tpu.pipeline_mode<synchronous>, transform_indices = @transform_3, window_bounds = array<i64: 128, 128>}, {pipeline_mode = #tpu.pipeline_mode<synchronous>, transform_indices = @transform_4, window_bounds = array<i64: 1, 128>}, {pipeline_mode = #tpu.pipeline_mode<synchronous>, transform_indices = @transform_5, window_bounds = array<i64: 128, 128>}, {pipeline_mode = #tpu.pipeline_mode<synchronous>, transform_indices = @transform_6, window_bounds = array<i64: 1, 128>}, {transform_indices = @transform_7, window_bounds = array<i64: 8, 128>}]} {
    %c0 = arith.constant 0 : index
    %c0_0 = arith.constant 0 : index
    %0 = vector.load %arg1[%c0, %c0_0] : memref<8x32xbf16, #tpu.memory_space<vmem>>, vector<8x32xbf16>
    %c0_1 = arith.constant 0 : index
    %c0_2 = arith.constant 0 : index
    %1 = vector.load %arg2[%c0_1, %c0_2] : memref<32x128xbf16, #tpu.memory_space<vmem>>, vector<32x128xbf16>
    %cst = arith.constant dense<0.000000e+00> : vector<8x128xf32>
    %2 = tpu.matmul %0, %1, %cst {dimension_numbers = #tpu.dot_dimension_numbers<[1], [0], [0], [1], [0, 0, 1, 1], [], []>} : vector<8x32xbf16>, vector<32x128xbf16>, vector<8x128xf32> -> vector<8x128xf32>
    %c0_3 = arith.constant 0 : index
    %c0_4 = arith.constant 0 : index
    %3 = vector.load %arg3[%c0_3, %c0_4] : memref<1x128xf32, #tpu.memory_space<vmem>>, vector<1x128xf32>
    %4 = vector.broadcast %3 : vector<1x128xf32> to vector<8x128xf32>
    %5 = arith.addf %2, %4 : vector<8x128xf32>
    %cst_5 = arith.constant 0.000000e+00 : f32
    %6 = vector.broadcast %cst_5 : f32 to vector<8x128xf32>
    %7 = arith.maximumf %5, %6 : vector<8x128xf32>
    %8 = arith.truncf %7 : vector<8x128xf32> to vector<8x128xbf16>
    %c0_6 = arith.constant 0 : index
    %c0_7 = arith.constant 0 : index
    %9 = vector.load %arg4[%c0_6, %c0_7] : memref<128x128xbf16, #tpu.memory_space<vmem>>, vector<128x128xbf16>
    %cst_8 = arith.constant dense<0.000000e+00> : vector<8x128xf32>
    %10 = tpu.matmul %8, %9, %cst_8 {dimension_numbers = #tpu.dot_dimension_numbers<[1], [0], [0], [1], [0, 0, 1, 1], [], []>} : vector<8x128xbf16>, vector<128x128xbf16>, vector<8x128xf32> -> vector<8x128xf32>
    %c0_9 = arith.constant 0 : index
    %c0_10 = arith.constant 0 : index
    %11 = vector.load %arg5[%c0_9, %c0_10] : memref<1x128xf32, #tpu.memory_space<vmem>>, vector<1x128xf32>
    %12 = vector.broadcast %11 : vector<1x128xf32> to vector<8x128xf32>
    %13 = arith.addf %10, %12 : vector<8x128xf32>
    %cst_11 = arith.constant 0.000000e+00 : f32
    %14 = vector.broadcast %cst_11 : f32 to vector<8x128xf32>
    %15 = arith.maximumf %13, %14 : vector<8x128xf32>
    %16 = arith.truncf %15 : vector<8x128xf32> to vector<8x128xbf16>
    %c0_12 = arith.constant 0 : index
    %c0_13 = arith.constant 0 : index
    %17 = vector.load %arg6[%c0_12, %c0_13] : memref<128x128xbf16, #tpu.memory_space<vmem>>, vector<128x128xbf16>
    %cst_14 = arith.constant dense<0.000000e+00> : vector<8x128xf32>
    %18 = tpu.matmul %16, %17, %cst_14 {dimension_numbers = #tpu.dot_dimension_numbers<[1], [0], [0], [1], [0, 0, 1, 1], [], []>} : vector<8x128xbf16>, vector<128x128xbf16>, vector<8x128xf32> -> vector<8x128xf32>
    %c0_15 = arith.constant 0 : index
    %c0_16 = arith.constant 0 : index
    %19 = vector.load %arg7[%c0_15, %c0_16] : memref<1x128xf32, #tpu.memory_space<vmem>>, vector<1x128xf32>
    %20 = vector.broadcast %19 : vector<1x128xf32> to vector<8x128xf32>
    %21 = arith.addf %18, %20 : vector<8x128xf32>
    %c0_17 = arith.constant 0 : index
    %c0_18 = arith.constant 0 : index
    %22 = vector.load %arg8[%c0_17, %c0_18] : memref<8x128xf32, #tpu.memory_space<vmem>>, vector<8x128xf32>
    tpu.vector_store %arg8[%c0_17, %c0_18], %21 {strides = array<i32>} : memref<8x128xf32, #tpu.memory_space<vmem>>, vector<8x128xf32>,
    return
  }
  func.func @transform_0(%arg0: i32) -> (i32, i32) {
    %c0_i32 = arith.constant 0 : i32
    %c0_i32_0 = arith.constant 0 : i32
    return %arg0, %c0_i32 : i32, i32
  }
  func.func @transform_1(%arg0: i32) -> (i32, i32) {
    %c0_i32 = arith.constant 0 : i32
    %c0_i32_0 = arith.constant 0 : i32
    %c0_i32_1 = arith.constant 0 : i32
    return %c0_i32, %c0_i32_0 : i32, i32
  }
  func.func @transform_2(%arg0: i32) -> (i32, i32) {
    %c0_i32 = arith.constant 0 : i32
    %c0_i32_0 = arith.constant 0 : i32
    %c0_i32_1 = arith.constant 0 : i32
    return %c0_i32, %c0_i32_0 : i32, i32
  }
  func.func @transform_3(%arg0: i32) -> (i32, i32) {
    %c0_i32 = arith.constant 0 : i32
    %c0_i32_0 = arith.constant 0 : i32
    %c0_i32_1 = arith.constant 0 : i32
    return %c0_i32, %c0_i32_0 : i32, i32
  }
  func.func @transform_4(%arg0: i32) -> (i32, i32) {
    %c0_i32 = arith.constant 0 : i32
    %c0_i32_0 = arith.constant 0 : i32
    %c0_i32_1 = arith.constant 0 : i32
    return %c0_i32, %c0_i32_0 : i32, i32
  }
  func.func @transform_5(%arg0: i32) -> (i32, i32) {
    %c0_i32 = arith.constant 0 : i32
    %c0_i32_0 = arith.constant 0 : i32
    %c0_i32_1 = arith.constant 0 : i32
    return %c0_i32, %c0_i32_0 : i32, i32
  }
  func.func @transform_6(%arg0: i32) -> (i32, i32) {
    %c0_i32 = arith.constant 0 : i32
    %c0_i32_0 = arith.constant 0 : i32
    %c0_i32_1 = arith.constant 0 : i32
    return %c0_i32, %c0_i32_0 : i32, i32
  }
  func.func @transform_7(%arg0: i32) -> (i32, i32) {
    %c0_i32 = arith.constant 0 : i32
    %c0_i32_0 = arith.constant 0 : i32
    return %arg0, %c0_i32 : i32, i32
  }
}

</mosaic_0001>

<bundles_post_ra>
// kernel: tpu_custom_call.1
= control target key start
LH: loop header
LB: loop body
LE: loop exit
PB: predicated region body
PF: predicated region fallthrough
CT: control target
= control target key end

     0   :  { %12 = vsyncpa [#allocation3], 0  ;;  %s613_s0 = inlined_call_operand.hbm [shape: bf16[8,32], index: 0, kind: input, shape index: {}]   ;;  %s614_s1 = inlined_call_operand.hbm [shape: bf16[32,128], index: 1, kind: input, shape index: {}]   ;;  %s615_s2 = inlined_call_operand.vmem [shape: f32[1,128], index: 2, kind: input, shape index: {}]   ;;  %s616_s3 = inlined_call_operand.hbm [shape: bf16[128,128], index: 3, kind: input, shape index: {}]   ;;  %s617_s4 = inlined_call_operand.vmem [shape: f32[1,128], index: 4, kind: input, shape index: {}]   ;;  %s618_s5 = inlined_call_operand.hbm [shape: bf16[128,128], index: 5, kind: input, shape index: {}]   ;;  %s619_s6 = inlined_call_operand.vmem [shape: f32[1,128], index: 6, kind: input, shape index: {}]   ;;  %s620_s7 = inlined_call_operand.hbm [shape: f32[8,128], index: 7, kind: output, shape index: {}]  }
   0x1   :  { %13 = vsyncpa [#allocation6], 0 }
   0x2   :  { %14 = vsyncpa [#allocation9], 0  ;;  %s31_s26 = sshll.u32 %s614_s1, 4  ;;  %s32_s26 = int_to_ptr.hbm [resolvable:$true] %s31_s26 }
   0x3   :  { %15 = vsyncpa [#allocation4], 0  ;;  %s542_s27 = smov [#allocation5]   ;;  %s21_s8 = sshll.u32 %s613_s0, 4  ;;  %s22_s8 = int_to_ptr.hbm [resolvable:$true] %s21_s8 }
   0x4   :  { %s33_s28 = sshll.u32 %s542_s27, 4  ;;  %s543_s9 = smov 64   ;;  %s34_s28 = int_to_ptr.vmem [resolvable:$true] %s33_s28 }
   0x5   :  { %s544_s10 = smov 4   ;;  %s545_s11 = smov [#allocation2]  }
   0x6   :  { %39 = dma.hbm_to_vmem [thread:$0]  %s32_s26, 256, %s34_s28, [#allocation6], %s543_s9, %s543_s9, %s544_s10  }
   0x7   :  { %s23_s12 = sshll.u32 %s545_s11, 4  ;;  %s46_s15 = sshll.u32 %s616_s3, 4  ;;  %s24_s12 = int_to_ptr.vmem [resolvable:$true] %s23_s12  ;;  %s47_s15 = int_to_ptr.hbm [resolvable:$true] %s46_s15 }
   0x8   :  { %26 = dma.hbm_to_vmem [thread:$0]  %s22_s8, 64, %s24_s12, [#allocation3]  }
   0x9   :  { %s61_s17 = sshll.u32 %s618_s5, 4  ;;  %s546_s18 = smov [#allocation7]   ;;  %s62_s17 = int_to_ptr.hbm [resolvable:$true] %s61_s17 }
   0xa   :  { %s48_s19 = sshll.u32 %s546_s18, 4  ;;  %s547_s0 = smov [#allocation8]   ;;  %s49_s19 = int_to_ptr.vmem [resolvable:$true] %s48_s19 }
   0xb   :  { %54 = dma.hbm_to_vmem [thread:$0]  %s47_s15, 1024, %s49_s19, [#allocation6], %s543_s9, %s543_s9, %s544_s10  }
   0xc   :  { %s63_s20 = sshll.u32 %s547_s0, 4  ;;  %s64_s20 = int_to_ptr.vmem [resolvable:$true] %s63_s20 }
   0xd   :  { %69 = dma.hbm_to_vmem [thread:$0]  %s62_s17, 1024, %s64_s20, [#allocation9], %s543_s9, %s543_s9, %s544_s10  }
   0xe   :  { %534 = dma.done.wait [#allocation3], 64  }
   0xf   :  { %535 = vsyncadd [#allocation3], 4294967232 }
  0x10   :  { %536 = dma.done.wait [#allocation6], 1280  }
  0x11   :  { %537 = vsyncadd [#allocation6], 4294966016 }
  0x12   :  { %538 = dma.done.wait [#allocation9], 1024  }
  0x13   :  { %539 = vsyncadd [#allocation9], 4294966272  ;;  %v387_v0 = vld [vmem:[#allocation5 + $0x8] sm:$0xff]  ;;  %v386_v2 = vld [vmem:[#allocation5] sm:$0xff]  ;;  %vm110_vm0 = vcmask 261120   ;;  %s548_s24 = smov [#allocation10]  }
  0x14   :  { %v395_v1 = vld [vmem:[#allocation7 + $0x38] sm:$0xff]  ;;  %120 = vmatpush.bf16.msra.mxu0 %v387_v0  ;;  %v394_v3 = vld [vmem:[#allocation7 + $0x30] sm:$0xff]  ;;  %v89_v4 = vld [vmem:[#allocation2] sm:$0xf]  ;;  %s299_s25 = sshll.u32 %s548_s24, 4  ;;  %s301_s28 = sshll.u32 %s620_s7, 4  ;;  %s300_s25 = int_to_ptr.vmem [resolvable:$true] %s299_s25  ;;  %s302_s28 = int_to_ptr.hbm [resolvable:$true] %s301_s28 }
  0x15   :  { %197 = vmatpush.bf16.msra.mxu1 %v395_v1  ;;  %v393_v5 = vld [vmem:[#allocation7 + $0x28] sm:$0xff]  ;;  %v392_v6 = vld [vmem:[#allocation7 + $0x20] sm:$0xff]  ;;  %v391_v7 = vld [vmem:[#allocation7 + $0x18] sm:$0xff] }
  0x16   :  { %v390_v8 = vld [vmem:[#allocation7 + $0x10] sm:$0xff]  ;;  %v389_v9 = vld [vmem:[#allocation7 + $0x8] sm:$0xff]  ;;  %v388_v10 = vld [vmem:[#allocation7] sm:$0xff] }
  0x17   :  { %v403_v11 = vld [vmem:[#allocation8 + $0x38] sm:$0xff]  ;;  %v402_v12 = vld [vmem:[#allocation8 + $0x30] sm:$0xff]  ;;  %v401_v13 = vld [vmem:[#allocation8 + $0x28] sm:$0xff] }
  0x18   :  { %121 = vmatpush.bf16.msra.mxu0 %v386_v2  ;;  %280 = vmatpush.bf16.msra.mxu2 %v403_v11  ;;  %v400_v14 = vld [vmem:[#allocation8 + $0x20] sm:$0xff]  ;;  %v399_v15 = vld [vmem:[#allocation8 + $0x18] sm:$0xff]  ;;  %v398_v16 = vld [vmem:[#allocation8 + $0x10] sm:$0xff] }
  0x19   :  { %198 = vmatpush.bf16.msra.mxu1 %v394_v3  ;;  %v411_v17 = vld [vmem:[%s615_s2] ss:$0 sm:$0xff]  ;;  %v396_v24 = vld [vmem:[#allocation8] sm:$0xff] }
  0x1a   :  { %v397_v23 = vld [vmem:[#allocation8 + $0x8] sm:$0xff] }
  0x1b   :  { %321 = vmatmul.msk.bf16.vlgmr.msra.gmra.mxu0 %vm110_vm0, %v89_v4  ;;  %v412_v25 = vld [vmem:[%s617_s4] ss:$0 sm:$0xff] }
  0x1c   :  { %281 = vmatpush.bf16.msra.mxu2 %v402_v12  ;;  %v413_v31 = vld [vmem:[%s619_s6] ss:$0 sm:$0xff] }
  0x1d   :  { %199 = vmatpush.bf16.msra.mxu1 %v393_v5 }
  0x20   :  { %282 = vmatpush.bf16.msra.mxu2 %v401_v13 }
  0x21   :  { %200 = vmatpush.bf16.msra.mxu1 %v392_v6 }
  0x24   :  { %283 = vmatpush.bf16.msra.mxu2 %v400_v14 }
  0x25   :  { %201 = vmatpush.bf16.msra.mxu1 %v391_v7 }
  0x28   :  { %284 = vmatpush.bf16.msra.mxu2 %v399_v15 }
  0x29   :  { %202 = vmatpush.bf16.msra.mxu1 %v390_v8 }
  0x2c   :  { %285 = vmatpush.bf16.msra.mxu2 %v398_v16 }
  0x2d   :  { %203 = vmatpush.bf16.msra.mxu1 %v389_v9 }
  0x30   :  { %286 = vmatpush.bf16.msra.mxu2 %v397_v23 }
  0x31   :  { %204 = vmatpush.bf16.msra.mxu1 %v388_v10 }
  0x34   :  { %287 = vmatpush.bf16.msra.mxu2 %v396_v24 }
  0x98   :  { %v123_v18 = vpop.f32.mrf.mxu0 }
  0x99   :  { %v124_v19 = vadd.f32 %v411_v17, %v123_v18 }
  0x9b   :  { %v127_v20 = vmax.f32 %v124_v19, 0.0 }
  0x9d   :  { %v128_v21 = vpack.c.bf16 %v127_v20, %v127_v20 }
  0x9f   :  { %205 = vmatmul.bf16.vlgmr.msra.gmra.mxu1 %v128_v21 }
  0xa0   :  { %v125_v22 = vpop.f32.mrf.mxu0 }
 0x11c   :  { %v206_v26 = vpop.f32.mrf.mxu1 }
 0x11d   :  { %v207_v27 = vadd.f32 %v412_v25, %v206_v26 }
 0x11f   :  { %v210_v28 = vmax.f32 %v207_v27, 0.0 }
 0x121   :  { %v211_v29 = vpack.c.bf16 %v210_v28, %v210_v28 }
 0x123   :  { %288 = vmatmul.bf16.vlgmr.msra.gmra.mxu2 %v211_v29 }
 0x124   :  { %v208_v30 = vpop.f32.mrf.mxu1 }
 0x1a6   :  { %v289_v32 = vpop.f32.mrf.mxu2 }
 0x1a7   :  { %v290_v33 = vadd.f32 %v413_v31, %v289_v32 }
 0x1a9   :  { %293 = vst [vmem:[#allocation10] sm:$0xff] %v290_v33 }
 0x1aa   :  { %304 = dma.vmem_to_hbm [thread:$0]  %s300_s25, 128, %s302_s28, [#allocation4]  }
 0x1ae   :  { %v291_v34 = vpop.f32.mrf.mxu2 }
 0x1af   :  { %540 = dma.done.wait [#allocation4], 128  }
 0x1b0   :  { %541 = vsyncadd [#allocation4], 4294967168 }
 0x1b1   :  { %309 = vsyncpa [#allocation3], 1 }
 0x1b2   :  { %310 = vsyncpa [#allocation6], 1 }
 0x1b3   :  { %311 = vsyncpa [#allocation9], 1 }
 0x1b4   :  { %312 = vsyncpa [#allocation4], 1 }

</bundles_post_ra>
